<compile_context>
chip_gen: v7x
topology: tpu7x:2x2x1
jax: 0.10.0
libtpu: 0.0.40
codegen_flags: <defaults>
</compile_context>

<pallas_src>
import math

import jax
import jax.numpy as jnp
from jax.experimental import pallas as pl
from jax.experimental.pallas import tpu as pltpu

BN_EPS = 1e-5
LANE = 128                      # lane width: pad all channel dims to a multiple of this

ACT_DTYPE = jnp.bfloat16        # activations fed to the MXU (halves DMA bytes)
MM_DTYPE = jnp.bfloat16         # conv weight matrices (f32 accumulation in-kernel)

# Tile caps. v6e (128 MiB VMEM) can raise TM_CAP to 1024; v7x (64 MiB) / v5e (16 MiB
# scoped default) are happy at these values.  All well inside the scoped-VMEM default.
TM_CAP = 512
TN_CAP = 256
TK_CAP = 512
BN_TM_CAP = 1024


def _round_up(x, q):
    return ((x + q - 1) // q) * q


def _pick_divisor(total, cap, quantum):
    """Largest multiple of `quantum` that divides `total` and is <= cap (>= quantum)."""
    cap = max(quantum, min(cap, total))
    cap = (cap // quantum) * quantum
    for d in range(cap, quantum - 1, -quantum):
        if total % d == 0:
            return d
    return total


# ----------------------------------------------------------------------------
# Pallas kernels
# ----------------------------------------------------------------------------
def _bn_relu_kernel(x_ref, scale_ref, shift_ref, o_ref):
    # x: (tm, C) f32; scale/shift: (1, C) broadcast over rows; output cast to o_ref dtype.
    y = x_ref[...] * scale_ref[...] + shift_ref[...]
    o_ref[...] = jnp.maximum(y, 0.0).astype(o_ref.dtype)


def _mm_plain_kernel(a_ref, b_ref, o_ref, acc_ref):
    @pl.when(pl.program_id(2) == 0)
    def _():
        acc_ref[...] = jnp.zeros_like(acc_ref)

    acc_ref[...] += jnp.dot(a_ref[...], b_ref[...], preferred_element_type=jnp.float32)

    @pl.when(pl.program_id(2) == pl.num_programs(2) - 1)
    def _():
        o_ref[...] = acc_ref[...].astype(o_ref.dtype)


def _mm_bn_relu_kernel(a_ref, b_ref, scale_ref, shift_ref, o_ref, acc_ref):
    @pl.when(pl.program_id(2) == 0)
    def _():
        acc_ref[...] = jnp.zeros_like(acc_ref)

    acc_ref[...] += jnp.dot(a_ref[...], b_ref[...], preferred_element_type=jnp.float32)

    @pl.when(pl.program_id(2) == pl.num_programs(2) - 1)
    def _():
        y = acc_ref[...] * scale_ref[...] + shift_ref[...]
        o_ref[...] = jnp.maximum(y, 0.0).astype(o_ref.dtype)


def _mm_add_kernel(a_ref, b_ref, d_ref, o_ref, acc_ref):
    @pl.when(pl.program_id(2) == 0)
    def _():
        acc_ref[...] = jnp.zeros_like(acc_ref)

    acc_ref[...] += jnp.dot(a_ref[...], b_ref[...], preferred_element_type=jnp.float32)

    @pl.when(pl.program_id(2) == pl.num_programs(2) - 1)
    def _():
        o_ref[...] = (acc_ref[...] + d_ref[...]).astype(o_ref.dtype)


# ----------------------------------------------------------------------------
# Pallas wrappers
# ----------------------------------------------------------------------------
def bn_relu(x2d, scale, shift, out_dtype):
    """Row-tiled elementwise y = relu(x * scale + shift)."""
    m, c = x2d.shape
    tm = min(BN_TM_CAP, _round_up(m, 16))
    m_pad = _round_up(m, tm)
    if m_pad != m:
        x2d = jnp.pad(x2d, ((0, m_pad - m), (0, 0)))
    out = pl.pallas_call(
        _bn_relu_kernel,
        out_shape=jax.ShapeDtypeStruct((m_pad, c), out_dtype),
        grid=(m_pad // tm,),
        in_specs=[
            pl.BlockSpec((tm, c), lambda i: (i, 0)),
            pl.BlockSpec((1, c), lambda i: (0, 0)),
            pl.BlockSpec((1, c), lambda i: (0, 0)),
        ],
        out_specs=pl.BlockSpec((tm, c), lambda i: (i, 0)),
        compiler_params=pltpu.CompilerParams(dimension_semantics=("parallel",)),
    )(x2d, scale, shift)
    return out if m_pad == m else out[:m]


def fused_matmul(a, b, *, scale=None, shift=None, addend=None, out_dtype=jnp.float32):
    """Tiled o = a @ b with an optional fused epilogue.

    scale/shift given  -> o = relu((a@b) * scale + shift)   (per-output-column)
    addend given       -> o = (a@b) + addend                (same tiling as output)
    neither            -> o = a@b
    """
    m, k = a.shape
    kb, n = b.shape
    assert k == kb, (k, kb)

    tk = _pick_divisor(k, TK_CAP, 128)
    tn = _pick_divisor(n, TN_CAP, 128)
    tm = min(TM_CAP, _round_up(m, 16))
    m_pad = _round_up(m, tm)
    if m_pad != m:
        a = jnp.pad(a, ((0, m_pad - m), (0, 0)))
        if addend is not None:
            addend = jnp.pad(addend, ((0, m_pad - m), (0, 0)))

    grid = (m_pad // tm, n // tn, k // tk)

    a_spec = pl.BlockSpec((tm, tk), lambda i, j, kk: (i, kk))
    b_spec = pl.BlockSpec((tk, tn), lambda i, j, kk: (kk, j))
    col_spec = pl.BlockSpec((1, tn), lambda i, j, kk: (0, j))
    out_tile_spec = pl.BlockSpec((tm, tn), lambda i, j, kk: (i, j))

    if scale is not None:
        kernel = _mm_bn_relu_kernel
        in_specs = [a_spec, b_spec, col_spec, col_spec]
        args = (a, b, scale, shift)
    elif addend is not None:
        kernel = _mm_add_kernel
        in_specs = [a_spec, b_spec, out_tile_spec]
        args = (a, b, addend)
    else:
        kernel = _mm_plain_kernel
        in_specs = [a_spec, b_spec]
        args = (a, b)

    out = pl.pallas_call(
        kernel,
        out_shape=jax.ShapeDtypeStruct((m_pad, n), out_dtype),
        grid_spec=pltpu.PrefetchScalarGridSpec(
            num_scalar_prefetch=0,
            grid=grid,
            in_specs=in_specs,
            out_specs=out_tile_spec,
            scratch_shapes=[pltpu.VMEM((tm, tn), jnp.float32)],
        ),
        compiler_params=pltpu.CompilerParams(
            dimension_semantics=("parallel", "parallel", "arbitrary")),
    )(*args)
    return out if m_pad == m else out[:m]


# ----------------------------------------------------------------------------
# Glue: im2col (plain JAX; see TODO above)
# ----------------------------------------------------------------------------
def _im2col(x_nhwc, kh, kw, stride, padding):
    n, h, w, c = x_nhwc.shape
    xp = jnp.pad(x_nhwc, ((0, 0), (padding, padding), (padding, padding), (0, 0)))
    ho = (h + 2 * padding - kh) // stride + 1
    wo = (w + 2 * padding - kw) // stride + 1
    taps = []
    for ky in range(kh):
        for kx in range(kw):
            taps.append(
                xp[:, ky:ky + stride * (ho - 1) + 1:stride,
                      kx:kx + stride * (wo - 1) + 1:stride, :]
            )
    patches = jnp.stack(taps, axis=3)                      # (N, Ho, Wo, kh*kw, C)
    return patches.reshape(n * ho * wo, kh * kw * c), (n, ho, wo)


# ----------------------------------------------------------------------------
# Parameter construction (deterministic WRN-style init; all padding / bf16 cast /
# Bayesian weight construction hoisted out of the forward path)
# ----------------------------------------------------------------------------
def make_bn_params(c, cp):
    gamma = jnp.ones((c,), jnp.float32)
    beta = jnp.zeros((c,), jnp.float32)
    running_mean = jnp.zeros((c,), jnp.float32)
    running_var = jnp.ones((c,), jnp.float32)
    scale = gamma / jnp.sqrt(running_var + BN_EPS)
    shift = beta - running_mean * scale
    # Padded channels get scale=0, shift=0 so they stay exactly zero through relu.
    scale = jnp.pad(scale, (0, cp - c))
    shift = jnp.pad(shift, (0, cp - c))
    return scale.reshape(1, cp), shift.reshape(1, cp)


def _to_wmat(w, cp_in, cp_out):
    cout, cin, kh, kw = w.shape                            # PyTorch (Cout, Cin, kh, kw)
    w = jnp.transpose(w, (2, 3, 1, 0))                     # (kh, kw, Cin, Cout)
    w = jnp.pad(w, ((0, 0), (0, 0), (0, cp_in - cin), (0, cp_out - cout)))
    return w.reshape(kh * kw * cp_in, cp_out).astype(MM_DTYPE)


def make_conv_wmats(key, cin, cout, k, cp_in, cp_out):
    fan = k * k * cout
    std = math.sqrt(2.0 / fan)
    k_mu, k_eps = jax.random.split(key)
    mu = std * jax.random.normal(k_mu, (cout, cin, k, k), jnp.float32)
    log_sigma = jnp.full((cout, cin, k, k), -5.0, jnp.float32)
    eps = jax.random.normal(k_eps, (cout, cin, k, k), jnp.float32)   # fixed, deterministic
    w_det = mu
    w_smp = mu + jnp.exp(log_sigma) * eps
    return {False: _to_wmat(w_det, cp_in, cp_out),
            True: _to_wmat(w_smp, cp_in, cp_out)}


def init_basic_block(key, cin, cout, stride, drop_rate):
    cp_in, cp_out = _round_up(cin, LANE), _round_up(cout, LANE)
    keys = jax.random.split(key, 3)
    p = {
        "equal": cin == cout,
        "stride": stride,
        "drop_rate": drop_rate,
        "cp_in": cp_in,
        "cp_out": cp_out,
        "out_planes": cout,
        "bn1": make_bn_params(cin, cp_in),
        "bn2": make_bn_params(cout, cp_out),
        "wmat1": make_conv_wmats(keys[0], cin, cout, 3, cp_in, cp_out),
        "wmat2": make_conv_wmats(keys[1], cout, cout, 3, cp_out, cp_out),
    }
    if not p["equal"]:
        p["wmat_sc"] = make_conv_wmats(keys[2], cin, cout, 1, cp_in, cp_out)
    return p


def init_network_block(key, nb_layers, in_planes, out_planes, stride, drop_rate=0.0):
    keys = jax.random.split(key, int(nb_layers))
    layers = []
    for i in range(int(nb_layers)):
        cin = in_planes if i == 0 else out_planes
        s = stride if i == 0 else 1
        layers.append(init_basic_block(keys[i], cin, out_planes, s, drop_rate))
    return layers


# ----------------------------------------------------------------------------
# Forward passes (mirror PyTorch BasicBlock / NetworkBlock)
# ----------------------------------------------------------------------------
def basic_block_forward(x, p, sample):
    """x: (N, H, W, cp_in) float32, channel-padded; returns (N, Ho, Wo, cp_out) float32."""
    sample = bool(sample)
    n, h, w, cp_in = x.shape
    cp_out = p["cp_out"]
    x2d = x.reshape(n * h * w, cp_in)

    # act1 = relu(bn1(x))  (tiled elementwise kernel, bf16 output for the MXU)
    s1, b1 = p["bn1"]
    act1 = bn_relu(x2d, s1, b1, ACT_DTYPE).reshape(n, h, w, cp_in)

    # out = relu(bn2(conv1(act1)))  -- BN+ReLU fused as the matmul epilogue
    patches1, (n_, ho, wo) = _im2col(act1, 3, 3, p["stride"], 1)
    s2, b2 = p["bn2"]
    act2 = fused_matmul(patches1, p["wmat1"][sample], scale=s2, shift=b2,
                        out_dtype=ACT_DTYPE).reshape(n_, ho, wo, cp_out)

    # TODO(synk): training-mode F.dropout not implemented (dropRate=0 / eval is identity).

    # Shortcut: raw x if equal in/out, else convShortcut(relu(bn1(x)))
    if p["equal"]:
        shortcut2d = x2d
    else:
        patches_sc, _ = _im2col(act1, 1, 1, p["stride"], 0)
        shortcut2d = fused_matmul(patches_sc, p["wmat_sc"][sample],
                                  out_dtype=jnp.float32)

    # y = conv2(act2) + shortcut  -- residual add fused as the matmul epilogue
    patches2, _ = _im2col(act2, 3, 3, 1, 1)
    y2d = fused_matmul(patches2, p["wmat2"][sample], addend=shortcut2d,
                       out_dtype=jnp.float32)
    return y2d.reshape(n_, ho, wo, cp_out)


def network_block_forward(x_nchw, layers, sample):
    x = jnp.transpose(x_nchw, (0, 2, 3, 1)).astype(jnp.float32)   # NCHW -> NHWC
    cin = x.shape[-1]
    cp_in = layers[0]["cp_in"]
    x = jnp.pad(x, ((0, 0), (0, 0), (0, 0), (0, cp_in - cin)))    # lane-pad channels once
    for p in layers:
        x = basic_block_forward(x, p, sample)
    x = x[..., :layers[-1]["out_planes"]]                         # drop channel padding
    return jnp.transpose(x, (0, 3, 1, 2))                         # NHWC -> NCHW


# ----------------------------------------------------------------------------
if __name__ == "__main__":
    key = jax.random.PRNGKey(0)
    k_params, k_x = jax.random.split(key)

    nb_layers, in_planes, out_planes, stride = 2, 4, 8, 2
    layers = init_network_block(k_params, nb_layers, in_planes, out_planes, stride,
                                drop_rate=0.0)

    x = jax.random.normal(k_x, (2, in_planes, 16, 16), jnp.float32)   # NCHW, like PyTorch
    y = network_block_forward(x, layers, sample=True)
    jax.block_until_ready(y)

    assert y.shape == (2, out_planes, 8, 8), y.shape
    assert jnp.all(jnp.isfinite(y))
    print("KERNEL_OK")
</pallas_src>

<mosaic_0001>
module attributes {stable_mosaic.version = 11 : i64} {
  func.func @_bn_relu_kernel(%arg0: i32, %arg1: memref<512x128xf32, #tpu.memory_space<vmem>>, %arg2: memref<1x128xf32, #tpu.memory_space<vmem>>, %arg3: memref<1x128xf32, #tpu.memory_space<vmem>>, %arg4: memref<512x128xbf16, #tpu.memory_space<vmem>>) attributes {dimension_semantics = [#tpu.dimension_semantics<parallel>], iteration_bounds = array<i64: 1>, scalar_prefetch = 0 : i64, scratch_operands = 0 : i64, tpu.core_type = #tpu.core_type<tc>, window_params = [{transform_indices = @transform_0, window_bounds = array<i64: 512, 128>}, {pipeline_mode = #tpu.pipeline_mode<synchronous>, transform_indices = @transform_1, window_bounds = array<i64: 1, 128>}, {pipeline_mode = #tpu.pipeline_mode<synchronous>, transform_indices = @transform_2, window_bounds = array<i64: 1, 128>}, {transform_indices = @transform_3, window_bounds = array<i64: 512, 128>}]} {
    %c0 = arith.constant 0 : index
    %c0_0 = arith.constant 0 : index
    %0 = vector.load %arg1[%c0, %c0_0] : memref<512x128xf32, #tpu.memory_space<vmem>>, vector<512x128xf32>
    %c0_1 = arith.constant 0 : index
    %c0_2 = arith.constant 0 : index
    %1 = vector.load %arg2[%c0_1, %c0_2] : memref<1x128xf32, #tpu.memory_space<vmem>>, vector<1x128xf32>
    %2 = vector.broadcast %1 : vector<1x128xf32> to vector<512x128xf32>
    %3 = arith.mulf %0, %2 : vector<512x128xf32>
    %c0_3 = arith.constant 0 : index
    %c0_4 = arith.constant 0 : index
    %4 = vector.load %arg3[%c0_3, %c0_4] : memref<1x128xf32, #tpu.memory_space<vmem>>, vector<1x128xf32>
    %5 = vector.broadcast %4 : vector<1x128xf32> to vector<512x128xf32>
    %6 = arith.addf %3, %5 : vector<512x128xf32>
    %cst = arith.constant 0.000000e+00 : f32
    %7 = vector.broadcast %cst : f32 to vector<512x128xf32>
    %8 = arith.maximumf %6, %7 : vector<512x128xf32>
    %9 = arith.truncf %8 : vector<512x128xf32> to vector<512x128xbf16>
    %c0_5 = arith.constant 0 : index
    %c0_6 = arith.constant 0 : index
    %10 = vector.load %arg4[%c0_5, %c0_6] : memref<512x128xbf16, #tpu.memory_space<vmem>>, vector<512x128xbf16>
    tpu.vector_store %arg4[%c0_5, %c0_6], %9 {strides = array<i32>} : memref<512x128xbf16, #tpu.memory_space<vmem>>, vector<512x128xbf16>,
    return
  }
  func.func @transform_0(%arg0: i32) -> (i32, i32) {
    %c0_i32 = arith.constant 0 : i32
    %c0_i32_0 = arith.constant 0 : i32
    return %arg0, %c0_i32 : i32, i32
  }
  func.func @transform_1(%arg0: i32) -> (i32, i32) {
    %c0_i32 = arith.constant 0 : i32
    %c0_i32_0 = arith.constant 0 : i32
    %c0_i32_1 = arith.constant 0 : i32
    return %c0_i32, %c0_i32_0 : i32, i32
  }
  func.func @transform_2(%arg0: i32) -> (i32, i32) {
    %c0_i32 = arith.constant 0 : i32
    %c0_i32_0 = arith.constant 0 : i32
    %c0_i32_1 = arith.constant 0 : i32
    return %c0_i32, %c0_i32_0 : i32, i32
  }
  func.func @transform_3(%arg0: i32) -> (i32, i32) {
    %c0_i32 = arith.constant 0 : i32
    %c0_i32_0 = arith.constant 0 : i32
    return %arg0, %c0_i32 : i32, i32
  }
}

</mosaic_0001>

<bundles_post_ra>
// kernel: tpu_custom_call.1
= control target key start
LH: loop header
LB: loop body
LE: loop exit
PB: predicated region body
PF: predicated region fallthrough
CT: control target
= control target key end

     0   :  { %8 = vsyncpa [#allocation3], 0  ;;  %s1199_s0 = inlined_call_operand.hbm [shape: f32[512,128], index: 0, kind: input, shape index: {}]   ;;  %s1200_s1 = inlined_call_operand.vmem [shape: f32[1,128], index: 1, kind: input, shape index: {}]   ;;  %s1201_s2 = inlined_call_operand.vmem [shape: f32[1,128], index: 2, kind: input, shape index: {}]   ;;  %s1202_s3 = inlined_call_operand.hbm [shape: bf16[512,128], index: 3, kind: output, shape index: {}]  }
   0x1   :  { %9 = vsyncpa [#allocation4], 0  ;;  %s1011_s12 = smov [#allocation2]   ;;  %s963_s16 = scalar_lea.hbm %s1199_s0, 8192 }
   0x2   :  { %s15_s13 = sshll.u32 %s1011_s12, 4  ;;  %p964_p0 = scmp.ne.s32.totalorder %s1199_s0, %s963_s16  ;;  %s16_s13 = int_to_ptr.vmem [resolvable:$true] %s15_s13 }
   0x3   :  { %p967_p1 = scmp.lt.u32.totalorder %s963_s16, %s1199_s0 }
   0x5   :  { %p969_p2 = pnand %p967_p1, %p964_p0 }
   0x7   :  { %972 = shalt.err (!%p969_p2)
}
   0x8   :  { %s973_s21 = scalar_lea.vmem %s16_s13, 8192  ;;  %p978_p4 = scmp.lt.s32.totalorder %s16_s13, %s16_s13 }
   0x9   :  { %p974_p3 = scmp.ne.s32.totalorder %s16_s13, %s973_s21  ;;  %p979_p5 = scmp.lt.s32.totalorder %s973_s21, %s973_s21 }
   0xb   :  { %p980_p6 = por %p979_p5, %p978_p4 }
   0xd   :  { %p981_p7 = pnand %p980_p6, %p974_p3 }
   0xf   :  { %984 = shalt.err (!%p981_p7)
}
  0x10   :  { %s1012_s22 = smov 128   ;;  %s1013_s23 = smov 8  }
  0x11   :  { %21 = dma.hbm_to_vmem [thread:$0]  %s1199_s0, 8192, %s16_s13, [#allocation3], %s1012_s22, %s1012_s22, %s1013_s23  }
  0x12   :  { %1007 = dma.done.wait [#allocation3], 8192  }
  0x13   :  { %1008 = vsyncadd [#allocation3], 4294959104  ;;  %v29_v0 = vld [vmem:[#allocation2] sm:$0xff]  ;;  %v30_v1 = vld [vmem:[#allocation2 + $0x8] sm:$0xff]  ;;  %s1014_s0 = smov [#allocation5]  }
  0x14   :  { %v1052_v2 = vld [vmem:[%s1200_s1] ss:$0 sm:$0xff]  ;;  %v31_v6 = vld [vmem:[#allocation2 + $0x10] sm:$0xff]  ;;  %v32_v7 = vld [vmem:[#allocation2 + $0x18] sm:$0xff]  ;;  %s624_s1 = sshll.u32 %s1014_s0, 4  ;;  %s625_s1 = int_to_ptr.vmem [resolvable:$true] %s624_s1 }
  0x15   :  { %v100_v3 = vmul.f32 %v1052_v2, %v29_v0  ;;  %v101_v4 = vmul.f32 %v1052_v2, %v30_v1  ;;  %v1059_v5 = vld [vmem:[%s1201_s2] ss:$0 sm:$0xff]  ;;  %v102_v8 = vmul.f32 %v1052_v2, %v31_v6  ;;  %v103_v9 = vmul.f32 %v1052_v2, %v32_v7  ;;  %v34_v11 = vld [vmem:[#allocation2 + $0x28] sm:$0xff]  ;;  %v35_v12 = vld [vmem:[#allocation2 + $0x30] sm:$0xff]  ;;  %s985_s2 = scalar_lea.vmem %s625_s1, 4096  ;;  %p990_p9 = scmp.lt.s32.totalorder %s625_s1, %s625_s1 }
  0x16   :  { %v33_v10 = vld [vmem:[#allocation2 + $0x20] sm:$0xff]  ;;  %v105_v16 = vmul.f32 %v1052_v2, %v34_v11  ;;  %v36_v17 = vld [vmem:[#allocation2 + $0x38] sm:$0xff]  ;;  %v106_v20 = vmul.f32 %v1052_v2, %v35_v12  ;;  %v38_v27 = vld [vmem:[#allocation2 + $0x48] sm:$0xff]  ;;  %p986_p8 = scmp.ne.s32.totalorder %s625_s1, %s985_s2  ;;  %p991_p10 = scmp.lt.s32.totalorder %s985_s2, %s985_s2 }
  0x17   :  { %v171_v13 = vadd.f32 %v1059_v5, %v100_v3  ;;  %v172_v14 = vadd.f32 %v1059_v5, %v101_v4  ;;  %v104_v15 = vmul.f32 %v1052_v2, %v33_v10  ;;  %v173_v18 = vadd.f32 %v1059_v5, %v102_v8  ;;  %v37_v22 = vld [vmem:[#allocation2 + $0x40] sm:$0xff]  ;;  %v39_v32 = vld [vmem:[#allocation2 + $0x50] sm:$0xff]  ;;  %v40_v33 = vld [vmem:[#allocation2 + $0x58] sm:$0xff] }
  0x18   :  { %v174_v19 = vadd.f32 %v1059_v5, %v103_v9  ;;  %v107_v21 = vmul.f32 %v1052_v2, %v36_v17  ;;  %v176_v26 = vadd.f32 %v1059_v5, %v105_v16  ;;  %v177_v30 = vadd.f32 %v1059_v5, %v106_v20  ;;  %v41_v38 = vld [vmem:[#allocation2 + $0x60] sm:$0xff]  ;;  %v42_v39 = vld [vmem:[#allocation2 + $0x68] sm:$0xff]  ;;  %v43_v44 = vld [vmem:[#allocation2 + $0x70] sm:$0xff]  ;;  %p992_p11 = por %p991_p10, %p990_p9 }
  0x19   :  { %v235_v23 = vmax.f32 %v171_v13, 0.0  ;;  %v236_v24 = vmax.f32 %v172_v14, 0.0  ;;  %v175_v25 = vadd.f32 %v1059_v5, %v104_v15  ;;  %v237_v28 = vmax.f32 %v173_v18, 0.0  ;;  %v44_v49 = vld [vmem:[#allocation2 + $0x78] sm:$0xff]  ;;  %v45_v54 = vld [vmem:[#allocation2 + $0x80] sm:$0xff]  ;;  %v46_v63 = vld [vmem:[#allocation2 + $0x88] sm:$0xff] }
  0x1a   :  { %v238_v29 = vmax.f32 %v174_v19, 0.0  ;;  %v178_v31 = vadd.f32 %v1059_v5, %v107_v21  ;;  %v240_v36 = vmax.f32 %v176_v26, 0.0  ;;  %v108_v37 = vmul.f32 %v1052_v2, %v37_v22  ;;  %v47_v6 = vld [vmem:[#allocation2 + $0x90] sm:$0xff]  ;;  %v48_v7 = vld [vmem:[#allocation2 + $0x98] sm:$0xff]  ;;  %v49_v12 = vld [vmem:[#allocation2 + $0xa0] sm:$0xff]  ;;  %p993_p12 = pnand %p992_p11, %p986_p8 }
  0x1b   :  { %v769_v34 = vpack.c.bf16 %v236_v24, %v235_v23  ;;  %v239_v35 = vmax.f32 %v175_v25, 0.0  ;;  %v241_v41 = vmax.f32 %v177_v30, 0.0  ;;  %v109_v43 = vmul.f32 %v1052_v2, %v38_v27  ;;  %v50_v13 = vld [vmem:[#allocation2 + $0xa8] sm:$0xff]  ;;  %v51_v18 = vld [vmem:[#allocation2 + $0xb0] sm:$0xff]  ;;  %v52_v23 = vld [vmem:[#allocation2 + $0xb8] sm:$0xff] }
  0x1c   :  { %v774_v40 = vpack.c.bf16 %v238_v29, %v237_v28  ;;  %v242_v42 = vmax.f32 %v178_v31, 0.0  ;;  %v179_v46 = vadd.f32 %v1059_v5, %v108_v37  ;;  %v110_v47 = vmul.f32 %v1052_v2, %v39_v32  ;;  %v53_v28 = vld [vmem:[#allocation2 + $0xc0] sm:$0xff]  ;;  %v54_v37 = vld [vmem:[#allocation2 + $0xc8] sm:$0xff] }
  0x1d   :  { %770 = vst [vmem:[#allocation5] sm:$0xff] %v769_v34   ;;  %v779_v45 = vpack.c.bf16 %v240_v36, %v239_v35  ;;  %v111_v48 = vmul.f32 %v1052_v2, %v40_v33  ;;  %v180_v51 = vadd.f32 %v1059_v5, %v109_v43  ;;  %v112_v52 = vmul.f32 %v1052_v2, %v41_v38  ;;  %v56_v43 = vld [vmem:[#allocation2 + $0xd8] sm:$0xff] }
  0x1e   :  { %926 = vst [vmem:[#allocation5 + $0x8] sm:$0xff] %v774_v40   ;;  %v784_v50 = vpack.c.bf16 %v242_v42, %v241_v41  ;;  %v113_v53 = vmul.f32 %v1052_v2, %v42_v39  ;;  %v243_v55 = vmax.f32 %v179_v46, 0.0  ;;  %v181_v56 = vadd.f32 %v1059_v5, %v110_v47  ;;  %v55_v42 = vld [vmem:[#allocation2 + $0xd0] sm:$0xff] }
  0x1f   :  { %927 = vst [vmem:[#allocation5 + $0x10] sm:$0xff] %v779_v45   ;;  %v182_v57 = vadd.f32 %v1059_v5, %v111_v48  ;;  %v114_v58 = vmul.f32 %v1052_v2, %v43_v44  ;;  %v244_v59 = vmax.f32 %v180_v51, 0.0  ;;  %v183_v60 = vadd.f32 %v1059_v5, %v112_v52  ;;  %v57_v48 = vld [vmem:[#allocation2 + $0xe0] sm:$0xff] }
  0x20   :  { %928 = vst [vmem:[#allocation5 + $0x18] sm:$0xff] %v784_v50   ;;  %v184_v61 = vadd.f32 %v1059_v5, %v113_v53  ;;  %v115_v62 = vmul.f32 %v1052_v2, %v44_v49  ;;  %v245_v0 = vmax.f32 %v181_v56, 0.0  ;;  %v116_v4 = vmul.f32 %v1052_v2, %v45_v54  ;;  %v58_v49 = vld [vmem:[#allocation2 + $0xe8] sm:$0xff]  ;;  %v59_v54 = vld [vmem:[#allocation2 + $0xf0] sm:$0xff] }
  0x21   :  { %v246_v1 = vmax.f32 %v182_v57, 0.0  ;;  %v185_v3 = vadd.f32 %v1059_v5, %v114_v58  ;;  %v789_v8 = vpack.c.bf16 %v244_v59, %v243_v55  ;;  %v247_v9 = vmax.f32 %v183_v60, 0.0  ;;  %v60_v59 = vld [vmem:[#allocation2 + $0xf8] sm:$0xff] }
  0x22   :  { %v248_v10 = vmax.f32 %v184_v61, 0.0  ;;  %v186_v11 = vadd.f32 %v1059_v5, %v115_v62  ;;  %v117_v16 = vmul.f32 %v1052_v2, %v46_v63  ;;  %v187_v17 = vadd.f32 %v1059_v5, %v116_v4 }
  0x23   :  { %v794_v14 = vpack.c.bf16 %v246_v1, %v245_v0  ;;  %v249_v15 = vmax.f32 %v185_v3, 0.0  ;;  %929 = vst [vmem:[#allocation5 + $0x20] sm:$0xff] %v789_v8   ;;  %v118_v21 = vmul.f32 %v1052_v2, %v47_v6  ;;  %v119_v22 = vmul.f32 %v1052_v2, %v48_v7  ;;  %v61_v0 = vld [vmem:[#allocation2 + $0x100] sm:$0xff] }
  0x24   :  { %v799_v19 = vpack.c.bf16 %v248_v10, %v247_v9  ;;  %v250_v20 = vmax.f32 %v186_v11, 0.0  ;;  %v188_v24 = vadd.f32 %v1059_v5, %v117_v16  ;;  %v251_v25 = vmax.f32 %v187_v17, 0.0  ;;  %v62_v11 = vld [vmem:[#allocation2 + $0x108] sm:$0xff]  ;;  %v63_v16 = vld [vmem:[#allocation2 + $0x110] sm:$0xff]  ;;  %v64_v17 = vld [vmem:[#allocation2 + $0x118] sm:$0xff] }
  0x25   :  { %930 = vst [vmem:[#allocation5 + $0x28] sm:$0xff] %v794_v14   ;;  %v120_v26 = vmul.f32 %v1052_v2, %v49_v12  ;;  %v121_v27 = vmul.f32 %v1052_v2, %v50_v13  ;;  %v189_v30 = vadd.f32 %v1059_v5, %v118_v21  ;;  %v190_v31 = vadd.f32 %v1059_v5, %v119_v22  ;;  %v65_v22 = vld [vmem:[#allocation2 + $0x120] sm:$0xff] }
  0x26   :  { %931 = vst [vmem:[#allocation5 + $0x30] sm:$0xff] %v799_v19   ;;  %v804_v29 = vpack.c.bf16 %v250_v20, %v249_v15  ;;  %v122_v32 = vmul.f32 %v1052_v2, %v51_v18  ;;  %v252_v33 = vmax.f32 %v188_v24, 0.0  ;;  %v123_v36 = vmul.f32 %v1052_v2, %v52_v23  ;;  %v66_v23 = vld [vmem:[#allocation2 + $0x128] sm:$0xff] }
  0x27   :  { %v191_v34 = vadd.f32 %v1059_v5, %v120_v26  ;;  %v192_v35 = vadd.f32 %v1059_v5, %v121_v27  ;;  %v253_v38 = vmax.f32 %v189_v30, 0.0  ;;  %v254_v39 = vmax.f32 %v190_v31, 0.0 }
  0x28   :  { %932 = vst [vmem:[#allocation5 + $0x38] sm:$0xff] %v804_v29   ;;  %v193_v40 = vadd.f32 %v1059_v5, %v122_v32  ;;  %v124_v41 = vmul.f32 %v1052_v2, %v53_v28  ;;  %v809_v44 = vpack.c.bf16 %v252_v33, %v251_v25  ;;  %v194_v47 = vadd.f32 %v1059_v5, %v123_v36  ;;  %v67_v28 = vld [vmem:[#allocation2 + $0x130] sm:$0xff]  ;;  %v68_v33 = vld [vmem:[#allocation2 + $0x138] sm:$0xff] }
  0x29   :  { %v255_v45 = vmax.f32 %v191_v34, 0.0  ;;  %v256_v46 = vmax.f32 %v192_v35, 0.0  ;;  %v814_v50 = vpack.c.bf16 %v254_v39, %v253_v38  ;;  %v125_v52 = vmul.f32 %v1052_v2, %v54_v37  ;;  %v69_v38 = vld [vmem:[#allocation2 + $0x140] sm:$0xff] }
  0x2a   :  { %v257_v51 = vmax.f32 %v193_v40, 0.0  ;;  %v195_v53 = vadd.f32 %v1059_v5, %v124_v41  ;;  %933 = vst [vmem:[#allocation5 + $0x40] sm:$0xff] %v809_v44   ;;  %v258_v56 = vmax.f32 %v194_v47, 0.0  ;;  %v126_v57 = vmul.f32 %v1052_v2, %v55_v42  ;;  %v70_v47 = vld [vmem:[#allocation2 + $0x148] sm:$0xff] }
  0x2b   :  { %v819_v55 = vpack.c.bf16 %v256_v46, %v255_v45  ;;  %v127_v58 = vmul.f32 %v1052_v2, %v56_v43  ;;  %934 = vst [vmem:[#allocation5 + $0x48] sm:$0xff] %v814_v50   ;;  %v196_v60 = vadd.f32 %v1059_v5, %v125_v52  ;;  %v128_v62 = vmul.f32 %v1052_v2, %v57_v48  ;;  %v71_v52 = vld [vmem:[#allocation2 + $0x150] sm:$0xff] }
  0x2c   :  { %v259_v61 = vmax.f32 %v195_v53, 0.0  ;;  %v129_v63 = vmul.f32 %v1052_v2, %v58_v49  ;;  %v824_v1 = vpack.c.bf16 %v258_v56, %v257_v51  ;;  %v197_v3 = vadd.f32 %v1059_v5, %v126_v57  ;;  %v72_v53 = vld [vmem:[#allocation2 + $0x158] sm:$0xff] }
  0x2d   :  { %935 = vst [vmem:[#allocation5 + $0x50] sm:$0xff] %v819_v55   ;;  %v198_v4 = vadd.f32 %v1059_v5, %v127_v58  ;;  %v130_v6 = vmul.f32 %v1052_v2, %v59_v54  ;;  %v260_v7 = vmax.f32 %v196_v60, 0.0  ;;  %v199_v8 = vadd.f32 %v1059_v5, %v128_v62  ;;  %v73_v58 = vld [vmem:[#allocation2 + $0x160] sm:$0xff] }
  0x2e   :  { %v200_v9 = vadd.f32 %v1059_v5, %v129_v63  ;;  %v131_v10 = vmul.f32 %v1052_v2, %v60_v59  ;;  %936 = vst [vmem:[#allocation5 + $0x58] sm:$0xff] %v824_v1   ;;  %v261_v12 = vmax.f32 %v197_v3, 0.0  ;;  %v132_v15 = vmul.f32 %v1052_v2, %v61_v0  ;;  %v74_v59 = vld [vmem:[#allocation2 + $0x168] sm:$0xff]  ;;  %v75_v0 = vld [vmem:[#allocation2 + $0x170] sm:$0xff] }
  0x2f   :  { %v262_v13 = vmax.f32 %v198_v4, 0.0  ;;  %v201_v14 = vadd.f32 %v1059_v5, %v130_v6  ;;  %v829_v18 = vpack.c.bf16 %v260_v7, %v259_v61  ;;  %v263_v19 = vmax.f32 %v199_v8, 0.0  ;;  %v76_v7 = vld [vmem:[#allocation2 + $0x178] sm:$0xff] }
  0x30   :  { %v264_v20 = vmax.f32 %v200_v9, 0.0  ;;  %v202_v21 = vadd.f32 %v1059_v5, %v131_v10  ;;  %v133_v26 = vmul.f32 %v1052_v2, %v62_v11  ;;  %v203_v27 = vadd.f32 %v1059_v5, %v132_v15 }
  0x31   :  { %v834_v24 = vpack.c.bf16 %v262_v13, %v261_v12  ;;  %v265_v25 = vmax.f32 %v201_v14, 0.0  ;;  %937 = vst [vmem:[#allocation5 + $0x60] sm:$0xff] %v829_v18   ;;  %v134_v31 = vmul.f32 %v1052_v2, %v63_v16  ;;  %v135_v32 = vmul.f32 %v1052_v2, %v64_v17  ;;  %v77_v12 = vld [vmem:[#allocation2 + $0x180] sm:$0xff] }
  0x32   :  { %v839_v29 = vpack.c.bf16 %v264_v20, %v263_v19  ;;  %v266_v30 = vmax.f32 %v202_v21, 0.0  ;;  %v204_v34 = vadd.f32 %v1059_v5, %v133_v26  ;;  %v267_v35 = vmax.f32 %v203_v27, 0.0  ;;  %v78_v21 = vld [vmem:[#allocation2 + $0x188] sm:$0xff]  ;;  %v79_v26 = vld [vmem:[#allocation2 + $0x190] sm:$0xff]  ;;  %v80_v27 = vld [vmem:[#allocation2 + $0x198] sm:$0xff] }
  0x33   :  { %938 = vst [vmem:[#allocation5 + $0x68] sm:$0xff] %v834_v24   ;;  %v136_v36 = vmul.f32 %v1052_v2, %v65_v22  ;;  %v137_v37 = vmul.f32 %v1052_v2, %v66_v23  ;;  %v205_v40 = vadd.f32 %v1059_v5, %v134_v31  ;;  %v206_v41 = vadd.f32 %v1059_v5, %v135_v32  ;;  %v81_v32 = vld [vmem:[#allocation2 + $0x1a0] sm:$0xff] }
  0x34   :  { %939 = vst [vmem:[#allocation5 + $0x70] sm:$0xff] %v839_v29   ;;  %v844_v39 = vpack.c.bf16 %v266_v30, %v265_v25  ;;  %v138_v42 = vmul.f32 %v1052_v2, %v67_v28  ;;  %v268_v43 = vmax.f32 %v204_v34, 0.0  ;;  %v139_v46 = vmul.f32 %v1052_v2, %v68_v33  ;;  %v82_v33 = vld [vmem:[#allocation2 + $0x1a8] sm:$0xff] }
  0x35   :  { %v207_v44 = vadd.f32 %v1059_v5, %v136_v36  ;;  %v208_v45 = vadd.f32 %v1059_v5, %v137_v37  ;;  %v269_v48 = vmax.f32 %v205_v40, 0.0  ;;  %v270_v49 = vmax.f32 %v206_v41, 0.0 }
  0x36   :  { %940 = vst [vmem:[#allocation5 + $0x78] sm:$0xff] %v844_v39   ;;  %v209_v50 = vadd.f32 %v1059_v5, %v138_v42  ;;  %v140_v51 = vmul.f32 %v1052_v2, %v69_v38  ;;  %v849_v54 = vpack.c.bf16 %v268_v43, %v267_v35  ;;  %v210_v57 = vadd.f32 %v1059_v5, %v139_v46  ;;  %v83_v38 = vld [vmem:[#allocation2 + $0x1b0] sm:$0xff]  ;;  %v84_v43 = vld [vmem:[#allocation2 + $0x1b8] sm:$0xff] }
  0x37   :  { %v271_v55 = vmax.f32 %v207_v44, 0.0  ;;  %v272_v56 = vmax.f32 %v208_v45, 0.0  ;;  %v854_v60 = vpack.c.bf16 %v270_v49, %v269_v48  ;;  %v141_v62 = vmul.f32 %v1052_v2, %v70_v47  ;;  %v85_v48 = vld [vmem:[#allocation2 + $0x1c0] sm:$0xff] }
  0x38   :  { %v273_v61 = vmax.f32 %v209_v50, 0.0  ;;  %v211_v63 = vadd.f32 %v1059_v5, %v140_v51  ;;  %941 = vst [vmem:[#allocation5 + $0x80] sm:$0xff] %v849_v54   ;;  %v274_v3 = vmax.f32 %v210_v57, 0.0  ;;  %v142_v4 = vmul.f32 %v1052_v2, %v71_v52  ;;  %v86_v57 = vld [vmem:[#allocation2 + $0x1c8] sm:$0xff] }
  0x39   :  { %v859_v1 = vpack.c.bf16 %v272_v56, %v271_v55  ;;  %v143_v6 = vmul.f32 %v1052_v2, %v72_v53  ;;  %942 = vst [vmem:[#allocation5 + $0x88] sm:$0xff] %v854_v60   ;;  %v212_v8 = vadd.f32 %v1059_v5, %v141_v62  ;;  %v144_v10 = vmul.f32 %v1052_v2, %v73_v58  ;;  %v87_v62 = vld [vmem:[#allocation2 + $0x1d0] sm:$0xff] }
  0x3a   :  { %v275_v9 = vmax.f32 %v211_v63, 0.0  ;;  %v145_v11 = vmul.f32 %v1052_v2, %v74_v59  ;;  %v864_v13 = vpack.c.bf16 %v274_v3, %v273_v61  ;;  %v213_v14 = vadd.f32 %v1059_v5, %v142_v4  ;;  %v88_v63 = vld [vmem:[#allocation2 + $0x1d8] sm:$0xff] }
  0x3b   :  { %943 = vst [vmem:[#allocation5 + $0x90] sm:$0xff] %v859_v1   ;;  %v214_v15 = vadd.f32 %v1059_v5, %v143_v6  ;;  %v146_v16 = vmul.f32 %v1052_v2, %v75_v0  ;;  %v276_v17 = vmax.f32 %v212_v8, 0.0  ;;  %v215_v18 = vadd.f32 %v1059_v5, %v144_v10  ;;  %v89_v6 = vld [vmem:[#allocation2 + $0x1e0] sm:$0xff] }
  0x3c   :  { %v216_v19 = vadd.f32 %v1059_v5, %v145_v11  ;;  %v147_v20 = vmul.f32 %v1052_v2, %v76_v7  ;;  %944 = vst [vmem:[#allocation5 + $0x98] sm:$0xff] %v864_v13   ;;  %v277_v22 = vmax.f32 %v213_v14, 0.0  ;;  %v148_v25 = vmul.f32 %v1052_v2, %v77_v12  ;;  %v90_v7 = vld [vmem:[#allocation2 + $0x1e8] sm:$0xff]  ;;  %v91_v12 = vld [vmem:[#allocation2 + $0x1f0] sm:$0xff] }
  0x3d   :  { %v278_v23 = vmax.f32 %v214_v15, 0.0  ;;  %v217_v24 = vadd.f32 %v1059_v5, %v146_v16  ;;  %v869_v28 = vpack.c.bf16 %v276_v17, %v275_v9  ;;  %v279_v29 = vmax.f32 %v215_v18, 0.0  ;;  %v92_v17 = vld [vmem:[#allocation2 + $0x1f8] sm:$0xff] }
  0x3e   :  { %v280_v30 = vmax.f32 %v216_v19, 0.0  ;;  %v218_v31 = vadd.f32 %v1059_v5, %v147_v20  ;;  %v149_v36 = vmul.f32 %v1052_v2, %v78_v21  ;;  %v219_v37 = vadd.f32 %v1059_v5, %v148_v25 }
  0x3f   :  { %v874_v34 = vpack.c.bf16 %v278_v23, %v277_v22  ;;  %v281_v35 = vmax.f32 %v217_v24, 0.0  ;;  %945 = vst [vmem:[#allocation5 + $0xa0] sm:$0xff] %v869_v28   ;;  %v150_v41 = vmul.f32 %v1052_v2, %v79_v26  ;;  %v151_v42 = vmul.f32 %v1052_v2, %v80_v27 }
  0x40   :  { %v879_v39 = vpack.c.bf16 %v280_v30, %v279_v29  ;;  %v282_v40 = vmax.f32 %v218_v31, 0.0  ;;  %v220_v44 = vadd.f32 %v1059_v5, %v149_v36  ;;  %v283_v45 = vmax.f32 %v219_v37, 0.0 }
  0x41   :  { %946 = vst [vmem:[#allocation5 + $0xa8] sm:$0xff] %v874_v34   ;;  %v152_v46 = vmul.f32 %v1052_v2, %v81_v32  ;;  %v153_v47 = vmul.f32 %v1052_v2, %v82_v33  ;;  %v221_v50 = vadd.f32 %v1059_v5, %v150_v41  ;;  %v222_v51 = vadd.f32 %v1059_v5, %v151_v42 }
  0x42   :  { %947 = vst [vmem:[#allocation5 + $0xb0] sm:$0xff] %v879_v39   ;;  %v884_v49 = vpack.c.bf16 %v282_v40, %v281_v35  ;;  %v154_v52 = vmul.f32 %v1052_v2, %v83_v38  ;;  %v284_v53 = vmax.f32 %v220_v44, 0.0  ;;  %v155_v56 = vmul.f32 %v1052_v2, %v84_v43 }
  0x43   :  { %v223_v54 = vadd.f32 %v1059_v5, %v152_v46  ;;  %v224_v55 = vadd.f32 %v1059_v5, %v153_v47  ;;  %v285_v58 = vmax.f32 %v221_v50, 0.0  ;;  %v286_v59 = vmax.f32 %v222_v51, 0.0 }
  0x44   :  { %948 = vst [vmem:[#allocation5 + $0xb8] sm:$0xff] %v884_v49   ;;  %v225_v60 = vadd.f32 %v1059_v5, %v154_v52  ;;  %v156_v61 = vmul.f32 %v1052_v2, %v85_v48  ;;  %v889_v0 = vpack.c.bf16 %v284_v53, %v283_v45  ;;  %v226_v4 = vadd.f32 %v1059_v5, %v155_v56 }
  0x45   :  { %v287_v1 = vmax.f32 %v223_v54, 0.0  ;;  %v288_v3 = vmax.f32 %v224_v55, 0.0  ;;  %v894_v8 = vpack.c.bf16 %v286_v59, %v285_v58  ;;  %v157_v10 = vmul.f32 %v1052_v2, %v86_v57 }
  0x46   :  { %v289_v9 = vmax.f32 %v225_v60, 0.0  ;;  %v227_v11 = vadd.f32 %v1059_v5, %v156_v61  ;;  %949 = vst [vmem:[#allocation5 + $0xc0] sm:$0xff] %v889_v0   ;;  %v290_v14 = vmax.f32 %v226_v4, 0.0  ;;  %v158_v15 = vmul.f32 %v1052_v2, %v87_v62 }
  0x47   :  { %v899_v13 = vpack.c.bf16 %v288_v3, %v287_v1  ;;  %v159_v16 = vmul.f32 %v1052_v2, %v88_v63  ;;  %950 = vst [vmem:[#allocation5 + $0xc8] sm:$0xff] %v894_v8   ;;  %v228_v18 = vadd.f32 %v1059_v5, %v157_v10  ;;  %v160_v20 = vmul.f32 %v1052_v2, %v89_v6 }
  0x48   :  { %v291_v19 = vmax.f32 %v227_v11, 0.0  ;;  %v161_v21 = vmul.f32 %v1052_v2, %v90_v7  ;;  %v904_v22 = vpack.c.bf16 %v290_v14, %v289_v9  ;;  %v229_v23 = vadd.f32 %v1059_v5, %v158_v15 }
  0x49   :  { %951 = vst [vmem:[#allocation5 + $0xd0] sm:$0xff] %v899_v13   ;;  %v230_v24 = vadd.f32 %v1059_v5, %v159_v16  ;;  %v162_v25 = vmul.f32 %v1052_v2, %v91_v12  ;;  %v292_v26 = vmax.f32 %v228_v18, 0.0  ;;  %v231_v27 = vadd.f32 %v1059_v5, %v160_v20 }
  0x4a   :  { %v232_v28 = vadd.f32 %v1059_v5, %v161_v21  ;;  %v163_v29 = vmul.f32 %v1052_v2, %v92_v17  ;;  %952 = vst [vmem:[#allocation5 + $0xd8] sm:$0xff] %v904_v22   ;;  %v293_v30 = vmax.f32 %v229_v23, 0.0 }
  0x4b   :  { %v294_v31 = vmax.f32 %v230_v24, 0.0  ;;  %v233_v32 = vadd.f32 %v1059_v5, %v162_v25  ;;  %v909_v33 = vpack.c.bf16 %v292_v26, %v291_v19  ;;  %v295_v34 = vmax.f32 %v231_v27, 0.0 }
  0x4c   :  { %v296_v35 = vmax.f32 %v232_v28, 0.0  ;;  %v234_v36 = vadd.f32 %v1059_v5, %v163_v29 }
  0x4d   :  { %v914_v37 = vpack.c.bf16 %v294_v31, %v293_v30  ;;  %v297_v38 = vmax.f32 %v233_v32, 0.0  ;;  %953 = vst [vmem:[#allocation5 + $0xe0] sm:$0xff] %v909_v33  }
  0x4e   :  { %v919_v39 = vpack.c.bf16 %v296_v35, %v295_v34  ;;  %v298_v40 = vmax.f32 %v234_v36, 0.0 }
  0x4f   :  { %954 = vst [vmem:[#allocation5 + $0xe8] sm:$0xff] %v914_v37  }
  0x50   :  { %955 = vst [vmem:[#allocation5 + $0xf0] sm:$0xff] %v919_v39   ;;  %v924_v2 = vpack.c.bf16 %v298_v40, %v297_v38 }
  0x52   :  { %956 = vst [vmem:[#allocation5 + $0xf8] sm:$0xff] %v924_v2  }
  0x53   :  { %996 = shalt.err (!%p993_p12)
}
  0x54   :  { %s997_s5 = scalar_lea.hbm %s1202_s3, 4096 }
  0x55   :  { %p998_p13 = scmp.ne.s32.totalorder %s1202_s3, %s997_s5  ;;  %p1001_p0 = scmp.lt.u32.totalorder %s997_s5, %s1202_s3 }
  0x57   :  { %p1003_p1 = pnand %p1001_p0, %p998_p13 }
  0x59   :  { %1006 = shalt.err (!%p1003_p1)
}
  0x5a   :  { %s1015_s10 = smov 64   ;;  %s1016_s11 = smov 4  }
  0x5b   :  { %630 = dma.vmem_to_hbm [thread:$0]  %s625_s1, 4096, %s1202_s3, [#allocation4], %s1015_s10, %s1015_s10, %s1016_s11  }
  0x5c   :  { %1009 = dma.done.wait [#allocation4], 4096  }
  0x5d   :  { %1010 = vsyncadd [#allocation4], 4294963200 }
  0x5e   :  { %634 = vsyncpa [#allocation3], 1 }
  0x5f   :  { %635 = vsyncpa [#allocation4], 1 }

</bundles_post_ra>
